<compile_context>
chip_gen: v7x
topology: tpu7x:2x2x1
jax: 0.10.0
libtpu: 0.0.40
codegen_flags: <defaults>
</compile_context>

<pallas_src>
import math
from functools import lru_cache

import numpy as np
import jax
import jax.numpy as jnp
from jax.experimental import pallas as pl
from jax.experimental.pallas import tpu as pltpu

STATE_DIM = 4        # reward only uses components 0, 1
ACTION_DIM = 2       # action supplies goal_points[0], goal_points[1]
D_IN = STATE_DIM + ACTION_DIM
HIDDEN = 128         # config['model_layers'] = [128, 128]
R_LANES = 128        # reward-constant lane width (10 real terms, the rest are zero-coef)
TB_CAP = 1024        # batch-tile cap (VMEM footprint stays small even at this size)

# ---- constants baked from state_cost -----------------------------------------
_OBS = np.array([[0, 0, 0, 0, 0, -0.8],
                 [0, 0.2, 0.4, 0.6, 0.8, -0.8],
                 [0, 0, 0, 0, 0, 0]], dtype=np.float32)
_N_OBS = _OBS.shape[1]
_GAUSS_ALPHA = 0.5 / 0.035                          # 0.5 * inv(diag(0.035, 0.035))
_GAUSS_COEF = 100.0 / (2.0 * math.pi * 0.035)       # 100 / sqrt((2*pi)^2 * det)
_BOUND_ALPHA = 0.5 / (0.03 * 0.03)
_BOUND_COEF = 10.0 / (0.03 * math.sqrt(2.0 * math.pi))
# 4 boundary gaussians: s0 @ -1.5, s0 @ +1.5, s1 @ +1.0, s1 @ -1.0
_BOUNDS = [(_BOUND_ALPHA, 0.0, -1.5, 0.0), (_BOUND_ALPHA, 0.0, 1.5, 0.0),
           (0.0, _BOUND_ALPHA, 0.0, 1.0), (0.0, _BOUND_ALPHA, 0.0, -1.0)]


def _reward_lane_constants():
    """(5, 128) rows: alpha_x, alpha_y, cx, cy, coef — one gaussian term per lane."""
    ax = np.zeros((R_LANES,), np.float32)
    ay = np.zeros((R_LANES,), np.float32)
    cx = np.zeros((R_LANES,), np.float32)
    cy = np.zeros((R_LANES,), np.float32)
    co = np.zeros((R_LANES,), np.float32)
    for i in range(_N_OBS):                      # 6 obstacle gaussians
        ax[i] = _GAUSS_ALPHA
        ay[i] = _GAUSS_ALPHA
        cx[i] = float(_OBS[0, i])
        cy[i] = float(_OBS[1, i])
        co[i] = _GAUSS_COEF
    for j, (bax, bay, bcx, bcy) in enumerate(_BOUNDS):   # 4 boundary gaussians
        k = _N_OBS + j
        ax[k], ay[k], cx[k], cy[k], co[k] = bax, bay, bcx, bcy, _BOUND_COEF
    # remaining lanes: coef = 0, alpha = 0  ->  0 * exp(0) = 0 contribution
    return np.stack([ax, ay, cx, cy, co])


_REWARD_CONSTS = _reward_lane_constants()


def dyn_reward_kernel(s_ref, a_ref, w1_ref, w2_ref, w3_ref, aux_ref,
                      sn_out_ref, r_out_ref):
    s = s_ref[...]                                   # (TB, 4)  f32
    a = a_ref[...]                                   # (TB, 2)  f32
    aux = aux_ref[...]                               # (8, 128) f32
    w1 = w1_ref[...]                                 # (6, 128) f32

    # ---- layer 1 on the VPU: 6 rank-1 multiply-adds (K=6 is tiny; avoids a
    # padded small-K matmul and any in-kernel concat of s|a) -----------------------
    h = aux[0:1, :] + s[:, 0:1] * w1[0:1, :]         # b1 + s0*w1[0]
    for j in range(1, STATE_DIM):
        h = h + s[:, j:j + 1] * w1[j:j + 1, :]
    for j in range(ACTION_DIM):
        k = STATE_DIM + j
        h = h + a[:, j:j + 1] * w1[k:k + 1, :]
    h1 = jnp.maximum(h, 0.0)                         # (TB, 128)

    # ---- layers 2 & 3 on the MXU (f32, matching the PyTorch reference) -----------
    h2 = jnp.maximum(
        jnp.dot(h1, w2_ref[...], preferred_element_type=jnp.float32) + aux[1:2, :],
        0.0)
    s_next_pad = jnp.dot(h2, w3_ref[...], preferred_element_type=jnp.float32)
    sn_out_ref[...] = s_next_pad[:, :STATE_DIM] + aux[2:3, :STATE_DIM]   # (TB, 4)

    # ---- known reward: 10 gaussian terms lane-vectorized -> ONE exp + lane reduce
    s0 = s[:, 0:1]
    s1 = s[:, 1:2]
    a0 = a[:, 0:1]                                   # goal_points[0] := action[0]
    a1 = a[:, 1:2]                                   # goal_points[1] := action[1]
    alpha_x = aux[3:4, :]
    alpha_y = aux[4:5, :]
    cx = aux[5:6, :]
    cy = aux[6:7, :]
    coef = aux[7:8, :]
    dx = s0 - cx                                     # (TB, 128) lane-dense
    dy = s1 - cy
    terms = coef * jnp.exp(-(alpha_x * dx * dx + alpha_y * dy * dy))
    gauss_and_bounds = jnp.sum(terms, axis=-1, keepdims=True)      # (TB, 1) XLU reduce
    goal_term = 30.0 * ((s0 - a0) ** 2 + (s1 - a1) ** 2)
    r_out_ref[...] = -(goal_term + gauss_and_bounds)               # (TB, 1)


def init_params(key):
    """Deterministic init matching PyTorch nn.Linear defaults (U(-1/sqrt(fan_in), ...))."""
    def linear(k, fan_in, fan_out):
        kw, kb = jax.random.split(k)
        lim = 1.0 / math.sqrt(fan_in)
        w = jax.random.uniform(kw, (fan_in, fan_out), jnp.float32, -lim, lim)
        b = jax.random.uniform(kb, (fan_out,), jnp.float32, -lim, lim)
        return w, b
    k1, k2, k3 = jax.random.split(key, 3)
    w1, b1 = linear(k1, D_IN, HIDDEN)
    w2, b2 = linear(k2, HIDDEN, HIDDEN)
    w3, b3 = linear(k3, HIDDEN, STATE_DIM)
    return w1, b1, w2, b2, w3, b3


def prepare_params(params):
    """Pad / pack raw Linear params ONCE (outside the per-call path). All f32."""
    w1, b1, w2, b2, w3, b3 = params
    w1 = jnp.asarray(w1, jnp.float32)                               # (6, 128)
    w2 = jnp.asarray(w2, jnp.float32)                               # (128, 128)
    w3p = (jnp.zeros((HIDDEN, HIDDEN), jnp.float32)                 # lane-pad head to 128
           .at[:, :STATE_DIM].set(w3))
    # single resident (8,128) f32 aux block: b1 | b2 | b3(pad) | 5 reward-const rows
    aux = (jnp.zeros((8, R_LANES), jnp.float32)
           .at[0, :].set(b1)
           .at[1, :].set(b2)
           .at[2, :STATE_DIM].set(b3)
           .at[3:8, :].set(jnp.asarray(_REWARD_CONSTS)))
    return w1, w2, w3p, aux


@lru_cache(maxsize=None)
def _num_tensorcores():
    """2 TensorCores per chip on v7x, 1 on v5e/v6e. Conservative fallback: 1."""
    try:
        kind = jax.devices()[0].device_kind.lower()
    except Exception:
        return 1
    return 2 if ("v7" in kind or "7x" in kind) else 1


def _tile_and_pad(B, n_cores):
    """Pick batch tile TB and padded batch Bp. grid=1/max tile on 1-TC chips; even
    split across both TCs on v7x. Ragged batches are padded, never asserted."""
    if n_cores <= 1 or B <= 8:
        TB = min(B, TB_CAP)
    else:
        TB = min(TB_CAP, max(8, ((pl.cdiv(B, n_cores) + 7) // 8) * 8))
    if TB >= B:
        return B, B                                  # single block == full batch
    Bp = pl.cdiv(B, TB) * TB
    return TB, Bp


@jax.jit
def dynamics_with_known_reward(s, a, prepared):
    w1, w2, w3p, aux = prepared
    B = s.shape[0]
    TB, Bp = _tile_and_pad(B, _num_tensorcores())

    s32 = s.astype(jnp.float32)
    a32 = a.astype(jnp.float32)
    if Bp != B:
        s32 = jnp.pad(s32, ((0, Bp - B), (0, 0)))
        a32 = jnp.pad(a32, ((0, Bp - B), (0, 0)))

    s_next, r = pl.pallas_call(
        dyn_reward_kernel,
        out_shape=(jax.ShapeDtypeStruct((Bp, STATE_DIM), jnp.float32),
                   jax.ShapeDtypeStruct((Bp, 1), jnp.float32)),
        grid_spec=pltpu.PrefetchScalarGridSpec(
            num_scalar_prefetch=0,
            grid=(Bp // TB,),
            in_specs=[
                pl.BlockSpec((TB, STATE_DIM), lambda i: (i, 0)),     # s tile over batch
                pl.BlockSpec((TB, ACTION_DIM), lambda i: (i, 0)),    # a tile over batch
                pl.BlockSpec((D_IN, HIDDEN), lambda i: (0, 0)),      # w1, resident
                pl.BlockSpec((HIDDEN, HIDDEN), lambda i: (0, 0)),    # w2, resident
                pl.BlockSpec((HIDDEN, HIDDEN), lambda i: (0, 0)),    # w3 (lane-padded)
                pl.BlockSpec((8, R_LANES), lambda i: (0, 0)),        # aux: biases + reward consts
            ],
            out_specs=(pl.BlockSpec((TB, STATE_DIM), lambda i: (i, 0)),   # s_next (B,4)
                       pl.BlockSpec((TB, 1), lambda i: (i, 0))),          # reward (B,1)
        ),
        compiler_params=pltpu.CompilerParams(
            dimension_semantics=("parallel",)),
    )(s32, a32, w1, w2, w3p, aux)

    if Bp != B:
        s_next = s_next[:B]
        r = r[:B]
    return s_next, r                                 # matches (s_next, r.unsqueeze(1))


if __name__ == "__main__":
    key = jax.random.PRNGKey(0)
    kp, ks, ka = jax.random.split(key, 3)

    raw = init_params(kp)
    prepared = prepare_params(raw)                   # padded/packed ONCE

    B = 16  # small example batch (config uses 256)
    s = jax.random.normal(ks, (B, STATE_DIM), jnp.float32)
    a = jax.random.uniform(ka, (B, ACTION_DIM), jnp.float32, -1.0, 1.0)

    s_next, r = dynamics_with_known_reward(s, a, prepared)
    jax.block_until_ready((s_next, r))
    assert s_next.shape == (B, STATE_DIM) and r.shape == (B, 1)

    # ---- float64 numpy reference sanity check (MLP + state_cost reward) ----------
    w1n, b1n, w2n, b2n, w3n, b3n = (np.asarray(p, np.float64) for p in raw)
    sn = np.asarray(s, np.float64)
    an = np.asarray(a, np.float64)
    x = np.concatenate([sn, an], axis=-1)
    h1 = np.maximum(x @ w1n + b1n, 0.0)
    h2 = np.maximum(h1 @ w2n + b2n, 0.0)
    sn_expected = h2 @ w3n + b3n

    r_expected = np.zeros((B, 1), np.float64)
    for i in range(B):
        st, gp = sn[i], an[i]
        gauss = 0.0
        for j in range(_N_OBS):
            d = st[:2] - _OBS[:2, j].astype(np.float64)
            gauss += 100.0 * np.exp(-0.5 * float(d @ d) / 0.035) / (2.0 * np.pi * 0.035)
        bound = (np.exp(-0.5 * ((st[0] + 1.5) / 0.03) ** 2)
                 + np.exp(-0.5 * ((st[0] - 1.5) / 0.03) ** 2)
                 + np.exp(-0.5 * ((st[1] - 1.0) / 0.03) ** 2)
                 + np.exp(-0.5 * ((st[1] + 1.0) / 0.03) ** 2)) / (0.03 * np.sqrt(2.0 * np.pi))
        cost = 30.0 * ((st[0] - gp[0]) ** 2 + (st[1] - gp[1]) ** 2) + gauss + 10.0 * bound
        r_expected[i, 0] = -cost

    np.testing.assert_allclose(np.asarray(s_next, np.float64), sn_expected,
                               rtol=2e-2, atol=2e-2)
    np.testing.assert_allclose(np.asarray(r, np.float64), r_expected,
                               rtol=2e-2, atol=2e-2)
    print("KERNEL_OK")
</pallas_src>

<mosaic_0001>
module attributes {stable_mosaic.version = 11 : i64} {
  func.func @dyn_reward_kernel(%arg0: i32, %arg1: memref<16x4xf32, #tpu.memory_space<vmem>>, %arg2: memref<16x2xf32, #tpu.memory_space<vmem>>, %arg3: memref<6x128xf32, #tpu.memory_space<vmem>>, %arg4: memref<128x128xf32, #tpu.memory_space<vmem>>, %arg5: memref<128x128xf32, #tpu.memory_space<vmem>>, %arg6: memref<8x128xf32, #tpu.memory_space<vmem>>, %arg7: memref<16x4xf32, #tpu.memory_space<vmem>>, %arg8: memref<16x1xf32, #tpu.memory_space<vmem>>) attributes {dimension_semantics = [#tpu.dimension_semantics<parallel>], iteration_bounds = array<i64: 1>, scalar_prefetch = 0 : i64, scratch_operands = 0 : i64, tpu.core_type = #tpu.core_type<tc>, window_params = [{transform_indices = @transform_0, window_bounds = array<i64: 16, 4>}, {transform_indices = @transform_1, window_bounds = array<i64: 16, 2>}, {pipeline_mode = #tpu.pipeline_mode<synchronous>, transform_indices = @transform_2, window_bounds = array<i64: 6, 128>}, {pipeline_mode = #tpu.pipeline_mode<synchronous>, transform_indices = @transform_3, window_bounds = array<i64: 128, 128>}, {pipeline_mode = #tpu.pipeline_mode<synchronous>, transform_indices = @transform_4, window_bounds = array<i64: 128, 128>}, {pipeline_mode = #tpu.pipeline_mode<synchronous>, transform_indices = @transform_5, window_bounds = array<i64: 8, 128>}, {transform_indices = @transform_6, window_bounds = array<i64: 16, 4>}, {transform_indices = @transform_7, window_bounds = array<i64: 16, 1>}]} {
    %c0 = arith.constant 0 : index
    %c0_0 = arith.constant 0 : index
    %0 = vector.load %arg1[%c0, %c0_0] : memref<16x4xf32, #tpu.memory_space<vmem>>, vector<16x4xf32>
    %c0_1 = arith.constant 0 : index
    %c0_2 = arith.constant 0 : index
    %1 = vector.load %arg2[%c0_1, %c0_2] : memref<16x2xf32, #tpu.memory_space<vmem>>, vector<16x2xf32>
    %c0_3 = arith.constant 0 : index
    %c0_4 = arith.constant 0 : index
    %2 = vector.load %arg6[%c0_3, %c0_4] : memref<8x128xf32, #tpu.memory_space<vmem>>, vector<8x128xf32>
    %c0_5 = arith.constant 0 : index
    %c0_6 = arith.constant 0 : index
    %3 = vector.load %arg3[%c0_5, %c0_6] : memref<6x128xf32, #tpu.memory_space<vmem>>, vector<6x128xf32>
    %4 = vector.extract_strided_slice %2 {offsets = [0, 0], sizes = [1, 128], strides = [1, 1]} : vector<8x128xf32> to vector<1x128xf32>
    %5 = vector.extract_strided_slice %0 {offsets = [0, 0], sizes = [16, 1], strides = [1, 1]} : vector<16x4xf32> to vector<16x1xf32>
    %6 = vector.extract_strided_slice %3 {offsets = [0, 0], sizes = [1, 128], strides = [1, 1]} : vector<6x128xf32> to vector<1x128xf32>
    %7 = vector.broadcast %5 : vector<16x1xf32> to vector<16x128xf32>
    %8 = vector.broadcast %6 : vector<1x128xf32> to vector<16x128xf32>
    %9 = arith.mulf %7, %8 : vector<16x128xf32>
    %10 = vector.broadcast %4 : vector<1x128xf32> to vector<16x128xf32>
    %11 = arith.addf %10, %9 : vector<16x128xf32>
    %12 = vector.extract_strided_slice %0 {offsets = [0, 1], sizes = [16, 1], strides = [1, 1]} : vector<16x4xf32> to vector<16x1xf32>
    %13 = vector.extract_strided_slice %3 {offsets = [1, 0], sizes = [1, 128], strides = [1, 1]} : vector<6x128xf32> to vector<1x128xf32>
    %14 = vector.broadcast %12 : vector<16x1xf32> to vector<16x128xf32>
    %15 = vector.broadcast %13 : vector<1x128xf32> to vector<16x128xf32>
    %16 = arith.mulf %14, %15 : vector<16x128xf32>
    %17 = arith.addf %11, %16 : vector<16x128xf32>
    %18 = vector.extract_strided_slice %0 {offsets = [0, 2], sizes = [16, 1], strides = [1, 1]} : vector<16x4xf32> to vector<16x1xf32>
    %19 = vector.extract_strided_slice %3 {offsets = [2, 0], sizes = [1, 128], strides = [1, 1]} : vector<6x128xf32> to vector<1x128xf32>
    %20 = vector.broadcast %18 : vector<16x1xf32> to vector<16x128xf32>
    %21 = vector.broadcast %19 : vector<1x128xf32> to vector<16x128xf32>
    %22 = arith.mulf %20, %21 : vector<16x128xf32>
    %23 = arith.addf %17, %22 : vector<16x128xf32>
    %24 = vector.extract_strided_slice %0 {offsets = [0, 3], sizes = [16, 1], strides = [1, 1]} : vector<16x4xf32> to vector<16x1xf32>
    %25 = vector.extract_strided_slice %3 {offsets = [3, 0], sizes = [1, 128], strides = [1, 1]} : vector<6x128xf32> to vector<1x128xf32>
    %26 = vector.broadcast %24 : vector<16x1xf32> to vector<16x128xf32>
    %27 = vector.broadcast %25 : vector<1x128xf32> to vector<16x128xf32>
    %28 = arith.mulf %26, %27 : vector<16x128xf32>
    %29 = arith.addf %23, %28 : vector<16x128xf32>
    %30 = vector.extract_strided_slice %1 {offsets = [0, 0], sizes = [16, 1], strides = [1, 1]} : vector<16x2xf32> to vector<16x1xf32>
    %31 = vector.extract_strided_slice %3 {offsets = [4, 0], sizes = [1, 128], strides = [1, 1]} : vector<6x128xf32> to vector<1x128xf32>
    %32 = vector.broadcast %30 : vector<16x1xf32> to vector<16x128xf32>
    %33 = vector.broadcast %31 : vector<1x128xf32> to vector<16x128xf32>
    %34 = arith.mulf %32, %33 : vector<16x128xf32>
    %35 = arith.addf %29, %34 : vector<16x128xf32>
    %36 = vector.extract_strided_slice %1 {offsets = [0, 1], sizes = [16, 1], strides = [1, 1]} : vector<16x2xf32> to vector<16x1xf32>
    %37 = vector.extract_strided_slice %3 {offsets = [5, 0], sizes = [1, 128], strides = [1, 1]} : vector<6x128xf32> to vector<1x128xf32>
    %38 = vector.broadcast %36 : vector<16x1xf32> to vector<16x128xf32>
    %39 = vector.broadcast %37 : vector<1x128xf32> to vector<16x128xf32>
    %40 = arith.mulf %38, %39 : vector<16x128xf32>
    %41 = arith.addf %35, %40 : vector<16x128xf32>
    %cst = arith.constant 0.000000e+00 : f32
    %42 = vector.broadcast %cst : f32 to vector<16x128xf32>
    %43 = arith.maximumf %41, %42 : vector<16x128xf32>
    %c0_7 = arith.constant 0 : index
    %c0_8 = arith.constant 0 : index
    %44 = vector.load %arg4[%c0_7, %c0_8] : memref<128x128xf32, #tpu.memory_space<vmem>>, vector<128x128xf32>
    %cst_9 = arith.constant dense<0.000000e+00> : vector<16x128xf32>
    %45 = tpu.matmul %43, %44, %cst_9 {dimension_numbers = #tpu.dot_dimension_numbers<[1], [0], [0], [1], [0, 0, 1, 1], [], []>} : vector<16x128xf32>, vector<128x128xf32>, vector<16x128xf32> -> vector<16x128xf32>
    %46 = vector.extract_strided_slice %2 {offsets = [1, 0], sizes = [1, 128], strides = [1, 1]} : vector<8x128xf32> to vector<1x128xf32>
    %47 = vector.broadcast %46 : vector<1x128xf32> to vector<16x128xf32>
    %48 = arith.addf %45, %47 : vector<16x128xf32>
    %cst_10 = arith.constant 0.000000e+00 : f32
    %49 = vector.broadcast %cst_10 : f32 to vector<16x128xf32>
    %50 = arith.maximumf %48, %49 : vector<16x128xf32>
    %c0_11 = arith.constant 0 : index
    %c0_12 = arith.constant 0 : index
    %51 = vector.load %arg5[%c0_11, %c0_12] : memref<128x128xf32, #tpu.memory_space<vmem>>, vector<128x128xf32>
    %cst_13 = arith.constant dense<0.000000e+00> : vector<16x128xf32>
    %52 = tpu.matmul %50, %51, %cst_13 {dimension_numbers = #tpu.dot_dimension_numbers<[1], [0], [0], [1], [0, 0, 1, 1], [], []>} : vector<16x128xf32>, vector<128x128xf32>, vector<16x128xf32> -> vector<16x128xf32>
    %53 = vector.extract_strided_slice %52 {offsets = [0, 0], sizes = [16, 4], strides = [1, 1]} : vector<16x128xf32> to vector<16x4xf32>
    %54 = vector.extract_strided_slice %2 {offsets = [2, 0], sizes = [1, 4], strides = [1, 1]} : vector<8x128xf32> to vector<1x4xf32>
    %55 = vector.broadcast %54 : vector<1x4xf32> to vector<16x4xf32>
    %56 = arith.addf %53, %55 : vector<16x4xf32>
    %c0_14 = arith.constant 0 : index
    %c0_15 = arith.constant 0 : index
    %57 = vector.load %arg7[%c0_14, %c0_15] : memref<16x4xf32, #tpu.memory_space<vmem>>, vector<16x4xf32>
    tpu.vector_store %arg7[%c0_14, %c0_15], %56 {strides = array<i32>} : memref<16x4xf32, #tpu.memory_space<vmem>>, vector<16x4xf32>,
    %58 = vector.extract_strided_slice %0 {offsets = [0, 0], sizes = [16, 1], strides = [1, 1]} : vector<16x4xf32> to vector<16x1xf32>
    %59 = vector.extract_strided_slice %0 {offsets = [0, 1], sizes = [16, 1], strides = [1, 1]} : vector<16x4xf32> to vector<16x1xf32>
    %60 = vector.extract_strided_slice %1 {offsets = [0, 0], sizes = [16, 1], strides = [1, 1]} : vector<16x2xf32> to vector<16x1xf32>
    %61 = vector.extract_strided_slice %1 {offsets = [0, 1], sizes = [16, 1], strides = [1, 1]} : vector<16x2xf32> to vector<16x1xf32>
    %62 = vector.extract_strided_slice %2 {offsets = [3, 0], sizes = [1, 128], strides = [1, 1]} : vector<8x128xf32> to vector<1x128xf32>
    %63 = vector.extract_strided_slice %2 {offsets = [4, 0], sizes = [1, 128], strides = [1, 1]} : vector<8x128xf32> to vector<1x128xf32>
    %64 = vector.extract_strided_slice %2 {offsets = [5, 0], sizes = [1, 128], strides = [1, 1]} : vector<8x128xf32> to vector<1x128xf32>
    %65 = vector.extract_strided_slice %2 {offsets = [6, 0], sizes = [1, 128], strides = [1, 1]} : vector<8x128xf32> to vector<1x128xf32>
    %66 = vector.extract_strided_slice %2 {offsets = [7, 0], sizes = [1, 128], strides = [1, 1]} : vector<8x128xf32> to vector<1x128xf32>
    %67 = vector.broadcast %58 : vector<16x1xf32> to vector<16x128xf32>
    %68 = vector.broadcast %64 : vector<1x128xf32> to vector<16x128xf32>
    %69 = arith.subf %67, %68 : vector<16x128xf32>
    %70 = vector.broadcast %59 : vector<16x1xf32> to vector<16x128xf32>
    %71 = vector.broadcast %65 : vector<1x128xf32> to vector<16x128xf32>
    %72 = arith.subf %70, %71 : vector<16x128xf32>
    %73 = vector.broadcast %62 : vector<1x128xf32> to vector<16x128xf32>
    %74 = arith.mulf %73, %69 : vector<16x128xf32>
    %75 = arith.mulf %74, %69 : vector<16x128xf32>
    %76 = vector.broadcast %63 : vector<1x128xf32> to vector<16x128xf32>
    %77 = arith.mulf %76, %72 : vector<16x128xf32>
    %78 = arith.mulf %77, %72 : vector<16x128xf32>
    %79 = arith.addf %75, %78 : vector<16x128xf32>
    %cst_16 = arith.constant 0.000000e+00 : f32
    %80 = vector.broadcast %cst_16 : f32 to vector<16x128xf32>
    %81 = arith.subf %80, %79 : vector<16x128xf32>
    %82 = math.exp %81 : vector<16x128xf32>
    %83 = vector.broadcast %66 : vector<1x128xf32> to vector<16x128xf32>
    %84 = arith.mulf %83, %82 : vector<16x128xf32>
    %cst_17 = arith.constant dense<0.000000e+00> : vector<16xf32>
    %85 = vector.multi_reduction <add>, %84, %cst_17 [1] : vector<16x128xf32> to vector<16xf32>
    %86 = vector.shape_cast %85 : vector<16xf32> to vector<16x1xf32>
    %87 = arith.subf %58, %60 : vector<16x1xf32>
    %88 = arith.mulf %87, %87 : vector<16x1xf32>
    %89 = arith.subf %59, %61 : vector<16x1xf32>
    %90 = arith.mulf %89, %89 : vector<16x1xf32>
    %91 = arith.addf %88, %90 : vector<16x1xf32>
    %cst_18 = arith.constant 3.000000e+01 : f32
    %92 = vector.broadcast %cst_18 : f32 to vector<16x1xf32>
    %93 = arith.mulf %92, %91 : vector<16x1xf32>
    %94 = arith.addf %93, %86 : vector<16x1xf32>
    %cst_19 = arith.constant 0.000000e+00 : f32
    %95 = vector.broadcast %cst_19 : f32 to vector<16x1xf32>
    %96 = arith.subf %95, %94 : vector<16x1xf32>
    %c0_20 = arith.constant 0 : index
    %c0_21 = arith.constant 0 : index
    %97 = vector.load %arg8[%c0_20, %c0_21] : memref<16x1xf32, #tpu.memory_space<vmem>>, vector<16x1xf32>
    tpu.vector_store %arg8[%c0_20, %c0_21], %96 {strides = array<i32>} : memref<16x1xf32, #tpu.memory_space<vmem>>, vector<16x1xf32>,
    return
  }
  func.func @transform_0(%arg0: i32) -> (i32, i32) {
    %c0_i32 = arith.constant 0 : i32
    %c0_i32_0 = arith.constant 0 : i32
    return %arg0, %c0_i32 : i32, i32
  }
  func.func @transform_1(%arg0: i32) -> (i32, i32) {
    %c0_i32 = arith.constant 0 : i32
    %c0_i32_0 = arith.constant 0 : i32
    return %arg0, %c0_i32 : i32, i32
  }
  func.func @transform_2(%arg0: i32) -> (i32, i32) {
    %c0_i32 = arith.constant 0 : i32
    %c0_i32_0 = arith.constant 0 : i32
    %c0_i32_1 = arith.constant 0 : i32
    return %c0_i32, %c0_i32_0 : i32, i32
  }
  func.func @transform_3(%arg0: i32) -> (i32, i32) {
    %c0_i32 = arith.constant 0 : i32
    %c0_i32_0 = arith.constant 0 : i32
    %c0_i32_1 = arith.constant 0 : i32
    return %c0_i32, %c0_i32_0 : i32, i32
  }
  func.func @transform_4(%arg0: i32) -> (i32, i32) {
    %c0_i32 = arith.constant 0 : i32
    %c0_i32_0 = arith.constant 0 : i32
    %c0_i32_1 = arith.constant 0 : i32
    return %c0_i32, %c0_i32_0 : i32, i32
  }
  func.func @transform_5(%arg0: i32) -> (i32, i32) {
    %c0_i32 = arith.constant 0 : i32
    %c0_i32_0 = arith.constant 0 : i32
    %c0_i32_1 = arith.constant 0 : i32
    return %c0_i32, %c0_i32_0 : i32, i32
  }
  func.func @transform_6(%arg0: i32) -> (i32, i32) {
    %c0_i32 = arith.constant 0 : i32
    %c0_i32_0 = arith.constant 0 : i32
    return %arg0, %c0_i32 : i32, i32
  }
  func.func @transform_7(%arg0: i32) -> (i32, i32) {
    %c0_i32 = arith.constant 0 : i32
    %c0_i32_0 = arith.constant 0 : i32
    return %arg0, %c0_i32 : i32, i32
  }
}

</mosaic_0001>

<bundles_post_ra>
// kernel: dynamics_with_known_reward.1
= control target key start
LH: loop header
LB: loop body
LE: loop exit
PB: predicated region body
PF: predicated region fallthrough
CT: control target
= control target key end

     0   :  { %13 = vsyncpa [#allocation3], 0  ;;  %s820_s0 = inlined_call_operand.vmem [shape: f32[16,4], index: 0, kind: input, shape index: {}]   ;;  %s821_s1 = inlined_call_operand.vmem [shape: f32[16,2], index: 1, kind: input, shape index: {}]   ;;  %s822_s2 = inlined_call_operand.vmem [shape: f32[6,128], index: 2, kind: input, shape index: {}]   ;;  %s823_s3 = inlined_call_operand.hbm [shape: f32[128,128], index: 3, kind: input, shape index: {}]   ;;  %s824_s4 = inlined_call_operand.hbm [shape: f32[128,128], index: 4, kind: input, shape index: {}]   ;;  %s825_s5 = inlined_call_operand.vmem [shape: f32[8,128], index: 5, kind: input, shape index: {}]   ;;  %s826_s6 = inlined_call_operand.vmem [shape: f32[16,4], index: 6, kind: output, shape index: {0}]   ;;  %s827_s7 = inlined_call_operand.vmem [shape: f32[16,1], index: 7, kind: output, shape index: {1}]  }
   0x1   :  { %14 = vsyncpa [#allocation5], 0  ;;  %s681_s24 = smov [#allocation2]   ;;  %s633_s28 = scalar_lea.hbm %s823_s3, 2048 }
   0x2   :  { %s26_s25 = sshll.u32 %s681_s24, 4  ;;  %p634_p0 = scmp.ne.s32.totalorder %s823_s3, %s633_s28  ;;  %s27_s25 = int_to_ptr.vmem [resolvable:$true] %s26_s25 }
   0x3   :  { %p637_p1 = scmp.lt.u32.totalorder %s633_s28, %s823_s3 }
   0x5   :  { %p639_p2 = pnand %p637_p1, %p634_p0 }
   0x7   :  { %642 = shalt.err (!%p639_p2)
}
   0x8   :  { %s643_s10 = scalar_lea.vmem %s27_s25, 2048  ;;  %p648_p4 = scmp.lt.s32.totalorder %s27_s25, %s27_s25 }
   0x9   :  { %p644_p3 = scmp.ne.s32.totalorder %s27_s25, %s643_s10  ;;  %p649_p5 = scmp.lt.s32.totalorder %s643_s10, %s643_s10 }
   0xb   :  { %p650_p6 = por %p649_p5, %p648_p4 }
   0xd   :  { %p651_p7 = pnand %p650_p6, %p644_p3 }
   0xf   :  { %654 = shalt.err (!%p651_p7)
}
  0x10   :  { %s682_s11 = smov 128   ;;  %s683_s12 = smov 8  }
  0x11   :  { %32 = dma.hbm_to_vmem [thread:$0]  %s823_s3, 2048, %s27_s25, [#allocation3], %s682_s11, %s682_s11, %s683_s12  }
  0x12   :  { %s684_s15 = smov [#allocation4]   ;;  %s655_s19 = scalar_lea.hbm %s824_s4, 2048 }
  0x13   :  { %s38_s16 = sshll.u32 %s684_s15, 4  ;;  %p656_p8 = scmp.ne.s32.totalorder %s824_s4, %s655_s19  ;;  %s39_s16 = int_to_ptr.vmem [resolvable:$true] %s38_s16 }
  0x14   :  { %p659_p9 = scmp.lt.u32.totalorder %s655_s19, %s824_s4 }
  0x16   :  { %p661_p10 = pnand %p659_p9, %p656_p8 }
  0x18   :  { %664 = shalt.err (!%p661_p10)
}
  0x19   :  { %s665_s24 = scalar_lea.vmem %s39_s16, 2048  ;;  %p670_p12 = scmp.lt.s32.totalorder %s39_s16, %s39_s16 }
  0x1a   :  { %p666_p11 = scmp.ne.s32.totalorder %s39_s16, %s665_s24  ;;  %p671_p13 = scmp.lt.s32.totalorder %s665_s24, %s665_s24 }
  0x1c   :  { %p672_p0 = por %p671_p13, %p670_p12 }
  0x1e   :  { %p673_p1 = pnand %p672_p0, %p666_p11 }
  0x20   :  { %676 = shalt.err (!%p673_p1)
}
  0x21   :  { %44 = dma.hbm_to_vmem [thread:$0]  %s824_s4, 2048, %s39_s16, [#allocation5], %s682_s11, %s682_s11, %s683_s12  }
  0x22   :  { %677 = dma.done.wait [#allocation3], 2048  }
  0x23   :  { %678 = vsyncadd [#allocation3], 4294965248 }
  0x24   :  { %679 = dma.done.wait [#allocation5], 2048  }
  0x25   :  { %680 = vsyncadd [#allocation5], 4294965248  ;;  %v685_v0 = vmov 1   ;;  %v686_v1 = vmov 0   ;;  %v53_v2 = vld [vmem:[%s820_s0] sm:$0xff]  ;;  %v54_v4 = vld [vmem:[%s820_s0 + $0x8] sm:$0xff]  ;;  %v69_v34 = vlaneseq }
  0x26   :  { %621 = vset.pattern.permute.xlu1 %v685_v0  ;;  %620 = vset.pattern.permute.xlu0 %v686_v1  ;;  %v55_v3 = vld [vmem:[%s821_s1] sm:$0xff]  ;;  %v56_v6 = vld [vmem:[%s821_s1 + $0x8] sm:$0xff]  ;;  %v167_v11 = vld [vmem:[#allocation2 + $0x10] sm:$0xff]  ;;  %v687_v14 = vmov 2   ;;  %v688_v20 = vmov 3   ;;  %vm428_vm0 = vcmask 7168  }
  0x27   :  { %82 = vperm.xlu1 %621, %v53_v2   ;;  %61 = vperm.xlu0 %620, %v53_v2   ;;  %v763_v5 = vsub.f32 %v53_v2, %v55_v3  ;;  %v768_v7 = vsub.f32 %v54_v4, %v56_v6  ;;  %v165_v8 = vld [vmem:[#allocation2] sm:$0xff]  ;;  %v166_v9 = vld [vmem:[#allocation2 + $0x8] sm:$0xff]  ;;  %v168_v12 = vld [vmem:[#allocation2 + $0x18] sm:$0xff]  ;;  %v770_v35 = vshrl.u32 %v69_v34, 7  ;;  %vm359_vm1 = vcmask 31744  }
  0x28   :  { %v547_v10 = vpack.c.bf16 %v166_v9, %v165_v8  ;;  %v551_v13 = vpack.c.bf16 %v168_v12, %v167_v11  ;;  %v169_v15 = vld [vmem:[#allocation2 + $0x20] sm:$0xff]  ;;  %v170_v16 = vld [vmem:[#allocation2 + $0x28] sm:$0xff]  ;;  %v171_v18 = vld [vmem:[#allocation2 + $0x30] sm:$0xff] }
  0x29   :  { %v555_v17 = vpack.c.bf16 %v170_v16, %v169_v15  ;;  %v172_v19 = vld [vmem:[#allocation2 + $0x38] sm:$0xff]  ;;  %v173_v22 = vld [vmem:[#allocation2 + $0x40] sm:$0xff]  ;;  %v174_v23 = vld [vmem:[#allocation2 + $0x48] sm:$0xff]  ;;  %v370_v36 = vsub.s32 6, %v770_v35  ;;  %v157_v37 = vsub.s32 5, %v770_v35  ;;  %v141_v39 = vsub.s32 4, %v770_v35 }
  0x2a   :  { %548 = vmatprep.subr.bf16.mxu0 %v547_v10  ;;  %v559_v21 = vpack.c.bf16 %v172_v19, %v171_v18  ;;  %v563_v24 = vpack.c.bf16 %v174_v23, %v173_v22  ;;  %v175_v25 = vld [vmem:[#allocation2 + $0x50] sm:$0xff]  ;;  %v176_v26 = vld [vmem:[#allocation2 + $0x58] sm:$0xff]  ;;  %v177_v28 = vld [vmem:[#allocation2 + $0x60] sm:$0xff]  ;;  %v123_v40 = vsub.s32 3, %v770_v35  ;;  %v71_v46 = vsub.s32 0, %v770_v35 }
  0x2b   :  { %86 = vperm.xlu1 %621, %v54_v4   ;;  %66 = vperm.xlu0 %620, %v54_v4   ;;  %v567_v27 = vpack.c.bf16 %v176_v26, %v175_v25  ;;  %v178_v29 = vld [vmem:[#allocation2 + $0x68] sm:$0xff]  ;;  %v179_v31 = vld [vmem:[#allocation2 + $0x70] sm:$0xff]  ;;  %v180_v32 = vld [vmem:[#allocation2 + $0x78] sm:$0xff]  ;;  %v91_v59 = vsub.s32 1, %v770_v35  ;;  %v107_v61 = vsub.s32 2, %v770_v35 }
  0x2c   :  { %550 = vmatpush3.bf16.msra.mxu0 %v547_v10  ;;  %v571_v30 = vpack.c.bf16 %v178_v29, %v177_v28  ;;  %v575_v33 = vpack.c.bf16 %v180_v32, %v179_v31  ;;  %v777_v38 = vld [vmem:[%s825_s5] sm:$0xff] }
  0x2d   :  { %552 = vmatprep.subr.bf16.mxu0 %v551_v13  ;;  %v371_v41 = vrot.slane %v777_v38, %v370_v36  ;;  %v365_v42 = vrot.slane %v777_v38, %v157_v37  ;;  %v385_v43 = vrot.slane %v777_v38, %v141_v39  ;;  %v377_v44 = vrot.slane %v777_v38, %v123_v40  ;;  %v58_v48 = vld [vmem:[%s822_s2] sm:$0x3f]  ;;  %s689_s2 = smov 127  }
  0x2e   :  { %v72_v53 = vrot.slane %v58_v48, %v71_v46  ;;  %v92_v9 = vrot.slane %v58_v48, %v91_v59  ;;  %v108_v11 = vrot.slane %v58_v48, %v107_v61  ;;  %v124_v15 = vrot.slane %v58_v48, %v123_v40 }
  0x2f   :  { %623 = vset.pattern.permute.xlu1 %v687_v14  ;;  %622 = vset.pattern.permute.xlu0 %v687_v14  ;;  %v142_v22 = vrot.slane %v58_v48, %v141_v39  ;;  %v158_v23 = vrot.slane %v58_v48, %v157_v37 }
  0x30   :  { %102 = vperm.xlu1 %623, %v54_v4   ;;  %98 = vperm.xlu0 %622, %v53_v2  }
  0x31   :  { %554 = vmatpush3.bf16.msra.mxu0 %v551_v13 }
  0x32   :  { %556 = vmatprep.subr.bf16.mxu0 %v555_v17 }
  0x34   :  { %624 = vset.pattern.permute.xlu1 %v688_v20  ;;  %625 = vset.pattern.permute.xlu0 %v688_v20 }
  0x35   :  { %114 = vperm.xlu1 %624, %v53_v2   ;;  %118 = vperm.xlu0 %625, %v54_v4  }
  0x36   :  { %558 = vmatpush3.bf16.msra.mxu0 %v555_v17 }
  0x37   :  { %560 = vmatprep.subr.bf16.mxu0 %v559_v21 }
  0x39   :  { %626 = vset.pattern.permute.xlu1 %v686_v1  ;;  %627 = vset.pattern.permute.xlu0 %v685_v0 }
  0x3a   :  { %131 = vperm.xlu1 %626, %v55_v3   ;;  %148 = vperm.xlu0 %627, %v55_v3  }
  0x3b   :  { %562 = vmatpush3.bf16.msra.mxu0 %v559_v21 }
  0x3c   :  { %564 = vmatprep.subr.bf16.mxu0 %v563_v24 }
  0x3e   :  { %136 = vperm.xlu1 %626, %v56_v6  }
  0x3f   :  { %566 = vmatpush3.bf16.msra.mxu0 %v563_v24 }
  0x40   :  { %568 = vmatprep.subr.bf16.mxu0 %v567_v27 }
  0x42   :  { %628 = vset.pattern.permute.xlu1 %v685_v0  ;;  %v78_v0 = vrot.slane %v777_v38, %v71_v46 }
  0x43   :  { %152 = vperm.xlu1 %628, %v56_v6   ;;  %570 = vmatpush3.bf16.msra.mxu0 %v567_v27  ;;  %v400_v27 = vsub.s32 7, %v770_v35 }
  0x44   :  { %572 = vmatprep.subr.bf16.mxu0 %v571_v30 }
  0x45   :  { %v401_v40 = vrot.slane %v777_v38, %v400_v27 }
  0x47   :  { %574 = vmatpush3.bf16.msra.mxu0 %v571_v30 }
  0x48   :  { %576 = vmatprep.subr.bf16.mxu0 %v575_v33 }
  0x4b   :  { %578 = vmatpush3.bf16.msra.mxu0 %v575_v33 }
  0xa6   :  { %v83_v45 = vpop.permute.xlu1 %82  ;;  %v62_v47 = vpop.permute.xlu0 %61 }
  0xa7   :  { %v372_v49 = vsub.f32 %v83_v45, %v371_v41  ;;  %v366_v50 = vsub.f32 %v62_v47, %v365_v42  ;;  %v73_v1 = vmul.f32 %v72_v53, %v62_v47  ;;  %v93_v17 = vmul.f32 %v92_v9, %v83_v45 }
  0xa9   :  { %v386_v51 = vmul.f32 %v385_v43, %v372_v49  ;;  %v378_v52 = vmul.f32 %v377_v44, %v366_v50  ;;  %v79_v13 = vadd.f32 %v78_v0, %v73_v1 }
  0xaa   :  { %v87_v54 = vpop.permute.xlu1 %86  ;;  %v67_v55 = vpop.permute.xlu0 %66 }
  0xab   :  { %v388_v56 = vmul.f32 %v386_v51, %v372_v49  ;;  %v380_v57 = vmul.f32 %v378_v52, %v366_v50  ;;  %v373_v58 = vsub.f32 %v87_v54, %v371_v41  ;;  %v367_v60 = vsub.f32 %v67_v55, %v365_v42 }
  0xac   :  { %v74_v16 = vmul.f32 %v72_v53, %v67_v55  ;;  %v95_v25 = vadd.f32 %v93_v17, %v79_v13  ;;  %v94_v30 = vmul.f32 %v92_v9, %v87_v54  ;;  %v268_v9 = vld [vmem:[#allocation4 + $0x30] sm:$0xff]  ;;  %v275_v17 = vld [vmem:[#allocation4 + $0x68] sm:$0xff] }
  0xad   :  { %v390_v62 = vadd.f32 %v388_v56, %v380_v57  ;;  %v387_v63 = vmul.f32 %v385_v43, %v373_v58  ;;  %v379_v2 = vmul.f32 %v377_v44, %v367_v60  ;;  %v272_v13 = vld [vmem:[#allocation4 + $0x50] sm:$0xff] }
  0xae   :  { %v80_v28 = vadd.f32 %v78_v0, %v74_v16  ;;  %v264_v0 = vld [vmem:[#allocation4 + $0x10] sm:$0xff]  ;;  %v274_v16 = vld [vmem:[#allocation4 + $0x60] sm:$0xff] }
  0xaf   :  { %v392_v3 = vsub.f32 0.0, %v390_v62  ;;  %v389_v4 = vmul.f32 %v387_v63, %v373_v58  ;;  %v103_v6 = vpop.permute.xlu1 %102  ;;  %v99_v8 = vpop.permute.xlu0 %98  ;;  %v381_v10 = vmul.f32 %v379_v2, %v367_v60  ;;  %v411_v58 = vmul.f32 %v768_v7, %v768_v7  ;;  %v262_v62 = vld [vmem:[#allocation4] sm:$0xff]  ;;  %v263_v63 = vld [vmem:[#allocation4 + $0x8] sm:$0xff]  ;;  %v265_v2 = vld [vmem:[#allocation4 + $0x18] sm:$0xff] }
  0xb0   :  { %v109_v19 = vmul.f32 %v108_v11, %v99_v8  ;;  %v96_v41 = vadd.f32 %v94_v30, %v80_v28  ;;  %v110_v42 = vmul.f32 %v108_v11, %v103_v6  ;;  %v410_v60 = vmul.f32 %v763_v5, %v763_v5  ;;  %v267_v6 = vld [vmem:[#allocation4 + $0x28] sm:$0xff]  ;;  %v269_v7 = vld [vmem:[#allocation4 + $0x38] sm:$0xff]  ;;  %v270_v11 = vld [vmem:[#allocation4 + $0x40] sm:$0xff] }
  0xb1   :  { %v394_v12 = vmul.f32 1.442695, %v392_v3  ;;  %v391_v14 = vadd.f32 %v389_v4, %v381_v10  ;;  %v579_v1 = vpack.c.bf16 %v263_v63, %v262_v62  ;;  %v583_v3 = vpack.c.bf16 %v265_v2, %v264_v0  ;;  %v266_v4 = vld [vmem:[#allocation4 + $0x20] sm:$0xff]  ;;  %v271_v5 = vld [vmem:[#allocation4 + $0x48] sm:$0xff] }
  0xb2   :  { %v111_v29 = vadd.f32 %v109_v19, %v95_v25  ;;  %v112_v47 = vadd.f32 %v110_v42, %v96_v41  ;;  %v587_v8 = vpack.c.bf16 %v267_v6, %v266_v4  ;;  %v591_v10 = vpack.c.bf16 %v269_v7, %v268_v9  ;;  %v276_v19 = vld [vmem:[#allocation4 + $0x70] sm:$0xff] }
  0xb3   :  { %629 = vpow2.f32 %v394_v12  ;;  %v393_v18 = vsub.f32 0.0, %v391_v14  ;;  %580 = vmatprep.subr.bf16.mxu1 %v579_v1  ;;  %v595_v12 = vpack.c.bf16 %v271_v5, %v270_v11  ;;  %v273_v14 = vld [vmem:[#allocation4 + $0x58] sm:$0xff] }
  0xb4   :  { %v115_v20 = vpop.permute.xlu1 %114  ;;  %v119_v21 = vpop.permute.xlu0 %118  ;;  %582 = vmatpush3.bf16.msra.mxu1 %v579_v1 }
  0xb5   :  { %v396_v24 = vmul.f32 1.442695, %v393_v18  ;;  %v125_v26 = vmul.f32 %v124_v15, %v115_v20  ;;  %v126_v43 = vmul.f32 %v124_v15, %v119_v21  ;;  %584 = vmatprep.subr.bf16.mxu1 %v583_v3  ;;  %v599_v15 = vpack.c.bf16 %v273_v14, %v272_v13  ;;  %v277_v20 = vld [vmem:[#allocation4 + $0x78] sm:$0xff] }
  0xb6   :  { %v603_v18 = vpack.c.bf16 %v275_v17, %v274_v16  ;;  %v607_v21 = vpack.c.bf16 %v277_v20, %v276_v19 }
  0xb7   :  { %631 = vpow2.f32 %v396_v24  ;;  %v127_v33 = vadd.f32 %v125_v26, %v111_v29  ;;  %v128_v50 = vadd.f32 %v126_v43, %v112_v47  ;;  %v356_v43 = vrot.slane %v777_v38, %v107_v61 }
  0xb8   :  { %586 = vmatpush3.bf16.msra.mxu1 %v583_v3 }
  0xb9   :  { %v132_v31 = vpop.permute.xlu1 %131  ;;  %v149_v32 = vpop.permute.xlu0 %148  ;;  %588 = vmatprep.subr.bf16.mxu1 %v587_v8 }
  0xba   :  { %v143_v34 = vmul.f32 %v142_v22, %v132_v31  ;;  %v159_v36 = vmul.f32 %v158_v23, %v149_v32 }
  0xbc   :  { %v145_v39 = vadd.f32 %v143_v34, %v127_v33  ;;  %590 = vmatpush3.bf16.msra.mxu1 %v587_v8  ;;  %v184_v34 = vrot.slane %v777_v38, %v91_v59 }
  0xbd   :  { %v630_v37 = vpop.eup %629  ;;  %v137_v44 = vpop.permute.xlu1 %136  ;;  %592 = vmatprep.subr.bf16.mxu1 %v591_v10 }
  0xbe   :  { %v402_v45 = vmul.f32 %v630_v37, %v401_v40  ;;  %v161_v46 = vadd.f32 %v159_v36, %v145_v39  ;;  %v144_v48 = vmul.f32 %v142_v22, %v137_v44 }
  0xc0   :  { %404 = vadd.xlane.f32.xlu1 %v402_v45  ;;  %v163_v49 = vmax.f32 %v161_v46, 0.0  ;;  %v146_v53 = vadd.f32 %v144_v48, %v128_v50  ;;  %594 = vmatpush3.bf16.msra.mxu1 %v591_v10 }
  0xc1   :  { %v632_v51 = vpop.eup %631  ;;  %596 = vmatprep.subr.bf16.mxu1 %v595_v12 }
  0xc2   :  { %v153_v52 = vpop.permute.xlu1 %152  ;;  %509 = vmatprep.mubr.f32.mxu0 %v163_v49  ;;  %v403_v55 = vmul.f32 %v632_v51, %v401_v40 }
  0xc3   :  { %v160_v54 = vmul.f32 %v158_v23, %v153_v52 }
  0xc4   :  { %406 = vadd.xlane.f32.xlu0 %v403_v55  ;;  %598 = vmatpush3.bf16.msra.mxu1 %v595_v12 }
  0xc5   :  { %v162_v56 = vadd.f32 %v160_v54, %v146_v53  ;;  %600 = vmatprep.subr.bf16.mxu1 %v599_v15 }
  0xc7   :  { %v164_v57 = vmax.f32 %v162_v56, 0.0 }
  0xc8   :  { %602 = vmatpush3.bf16.msra.mxu1 %v599_v15 }
  0xc9   :  { %510 = vmatmul.mubr.f32.vlgmr.msra.gmra.mrb[0].mxu0 %v164_v57  ;;  %604 = vmatprep.subr.bf16.mxu1 %v603_v18 }
  0xcc   :  { %606 = vmatpush3.bf16.msra.mxu1 %v603_v18 }
  0xcd   :  { %608 = vmatprep.subr.bf16.mxu1 %v607_v21 }
  0xd0   :  { %610 = vmatpush3.bf16.msra.mxu1 %v607_v21 }
  0xd1   :  { %416 = vrot.lane.b32.xlu1 %v411_v58, %s689_s2 }
  0xda   :  { %414 = vrot.lane.b32.xlu0 %v410_v60, %s689_s2 }
 0x14d   :  { %v405_v22 = vpop.xlane.xlu1 %404 }
 0x151   :  { %v417_v23 = vpop.permute.xlu1 %416  ;;  %v407_v25 = vpop.xlane.xlu0 %406 }
 0x152   :  { %v421_v24 = vadd.f32 %v417_v23, %v411_v58 }
 0x154   :  { %v423_v26 = vmul.f32 30.0, %v421_v24 }
 0x155   :  { %v415_v28 = vpop.permute.xlu0 %414 }
 0x156   :  { %v425_v27 = vadd.f32 %v423_v26, %v407_v25  ;;  %v420_v29 = vadd.f32 %v415_v28, %v410_v60 }
 0x158   :  { %v427_v30 = vsub.f32 0.0, %v425_v27  ;;  %v422_v31 = vmul.f32 30.0, %v420_v29 }
 0x15a   :  { %430 = vst.msk [vmem:[%s827_s7 + $0x8] sm:$0xff] %vm428_vm0, %v427_v30  ;;  %v424_v32 = vadd.f32 %v422_v31, %v405_v22 }
 0x15c   :  { %v426_v33 = vsub.f32 0.0, %v424_v32 }
 0x15e   :  { %429 = vst.msk [vmem:[%s827_s7] sm:$0xff] %vm428_vm0, %v426_v33 }
 0x19c   :  { %v511_v36 = vpop.f32.mrb[0].mxu0 }
 0x19d   :  { %v257_v40 = vadd.f32 %v511_v36, %v184_v34  ;;  %v251_v41 = vpop.f32.mrb[1].mxu0 }
 0x19e   :  { %v252_v42 = vadd.f32 %v251_v41, %v184_v34 }
 0x19f   :  { %v261_v37 = vmax.f32 %v257_v40, 0.0 }
 0x1a0   :  { %v260_v39 = vmax.f32 %v252_v42, 0.0 }
 0x1a2   :  { %544 = vmatprep.mubr.f32.mxu1 %v260_v39 }
 0x1a3   :  { %545 = vmatmul.mubr.f32.vlgmr.msra.gmra.mrb[0].mxu1 %v261_v37 }
 0x276   :  { %v546_v44 = vpop.f32.mrb[0].mxu1 }
 0x277   :  { %v358_v45 = vadd.f32 %v546_v44, %v356_v43  ;;  %v344_v46 = vpop.f32.mrb[1].mxu1 }
 0x278   :  { %v357_v47 = vadd.f32 %v356_v43, %v344_v46 }
 0x279   :  { %361 = vst.msk [vmem:[%s826_s6 + $0x8] sm:$0xff] %vm359_vm1, %v358_v45 }
 0x27a   :  { %360 = vst.msk [vmem:[%s826_s6] sm:$0xff] %vm359_vm1, %v357_v47 }
 0x27b   :  { %439 = vsyncpa [#allocation3], 1 }
 0x27c   :  { %440 = vsyncpa [#allocation5], 1 }

</bundles_post_ra>
